<compile_context>
chip_gen: v7x
topology: tpu7x:2x2x1
jax: 0.10.0
libtpu: 0.0.40
codegen_flags: <defaults>
</compile_context>

<pallas_src>
import jax
import jax.numpy as jnp
from jax import lax
from jax.experimental import pallas as pl
from jax.experimental.pallas import tpu as pltpu


def _round_up(n, m):
    return ((n + m - 1) // m) * m


def _vmem_capacity_bytes():
    """Per-core VMEM capacity; conservative fallback if the query is unavailable."""
    try:
        info = pltpu.get_tpu_info()
        cap = getattr(info, "vmem_capacity_bytes", None)
        if cap:
            return int(cap)
    except Exception:
        pass
    return 64 << 20  # v7x physical size; conservative for v5e/v6e (128 MiB)


def _make_mlp_kernel(matmul_dtype):
    def kernel(x_ref, w1_ref, b1_ref, w2_ref, b2_ref, o_ref):
        # x_ref : (TB, D) f32    natural (batch, feature) layout
        # w1_ref: (H, D)  bf16
        # b1_ref: (H, 1)  f32
        # w2_ref: (O, H)  bf16
        # b2_ref: (O, 1)  f32
        # o_ref : (O, TB) f32    lane-dense (batch on lane axis)
        x = x_ref[...].astype(matmul_dtype)          # in-kernel cast (VMEM only)
        # Layer 1: contract D of both operands -> (H, TB); batch lands on lanes.
        h = lax.dot_general(
            w1_ref[...], x,
            dimension_numbers=(((1,), (1,)), ((), ())),
            preferred_element_type=jnp.float32)
        h = jnp.maximum(h + b1_ref[...], 0.0)        # bias + ReLU on the VPU (f32)
        # Layer 2: (O, H) @ (H, TB) -> (O, TB); bf16 operands, f32 accumulate.
        out = jnp.dot(w2_ref[...], h.astype(matmul_dtype),
                      preferred_element_type=jnp.float32) + b2_ref[...]
        o_ref[...] = out.astype(o_ref.dtype)
    return kernel


def mlp_forward(x, w1, b1, w2, b2, *, tile_b=None,
                matmul_dtype=jnp.bfloat16, min_pallas_batch=1024):
    """relu(x @ w1.T + b1) @ w2.T + b2.

    x : (B, D) f32, w1: (H, D), b1: (H,), w2: (O, H), b2: (O,)  ->  (B, O) f32.
    """
    B, D = x.shape
    H, D1 = w1.shape
    O, H1 = w2.shape
    assert D1 == D and H1 == H and b1.shape == (H,) and b2.shape == (O,)

    # Small-batch escape hatch: fixed pallas_call overhead dominates below a
    # few thousand rows; plain XLA fusion wins and keeps exact f32 semantics.
    if B < min_pallas_batch:
        h = jnp.maximum(x.astype(jnp.float32) @ w1.T + b1[None, :], 0.0)
        return h @ w2.T + b2[None, :]

    vmem_limit_cap = (_vmem_capacity_bytes() * 3) // 4   # 25% headroom (48 MiB on v7x)

    if tile_b is None:
        # Tile-dependent VMEM per batch row: double-buffered f32 x tile and
        # f32 out tile, plus in-kernel bf16 copies of x/h and f32 h/out temps.
        per_row = 10 * D + 6 * H + 12 * O
        vmem_tile_cap = max(256, ((vmem_limit_cap // 2) // per_row) // 256 * 256)
        # Big tiles (amortize per-step overhead), but at least 2 tiles for
        # medium batches so both v7x TensorCores get work.
        tile_b = max(256, min(32768, vmem_tile_cap,
                              _round_up(pl.cdiv(B, 2), 256)))
    else:
        tile_b = max(256, _round_up(tile_b, 256))

    Bp = _round_up(B, tile_b)
    pad = Bp - B
    x_in = x.astype(jnp.float32)
    if pad:
        # Padded rows produce garbage columns in the padded output region only;
        # they are sliced off below and never reduced over.
        x_in = jnp.pad(x_in, ((0, pad), (0, 0)))

    w1_m = w1.astype(matmul_dtype)                    # (H, D)
    b1_c = b1.reshape(H, 1).astype(jnp.float32)       # (H, 1)
    w2_m = w2.astype(matmul_dtype)                    # (O, H)  bf16 layer-2 operand
    b2_c = b2.reshape(O, 1).astype(jnp.float32)       # (O, 1)

    psize = jnp.dtype(matmul_dtype).itemsize
    vmem_need = (2 * tile_b * D * 4                   # x tiles (f32, double-buffered)
                 + 2 * tile_b * O * 4                 # out tiles (f32, double-buffered)
                 + tile_b * (D + H) * psize           # bf16 copies of x / h
                 + tile_b * (H + O) * 4               # f32 h / out temporaries
                 + 2 * (H * D + O * H) * psize        # resident weights (2 buffers)
                 + 2 * (H + O) * 4)                   # resident biases
    vmem_limit = int(min(max(2 * vmem_need, 8 << 20), vmem_limit_cap))

    cost = pl.CostEstimate(
        flops=2 * Bp * D * H + 2 * Bp * H * O,
        transcendentals=0,
        bytes_accessed=(Bp * D * 4 + Bp * O * 4
                        + (H * D + O * H) * psize + (H + O) * 4),
    )

    grid = (Bp // tile_b,)
    out_t = pl.pallas_call(
        _make_mlp_kernel(matmul_dtype),
        out_shape=jax.ShapeDtypeStruct((O, Bp), jnp.float32),
        grid=grid,
        in_specs=[
            pl.BlockSpec((tile_b, D), lambda i: (i, 0)),   # x tile (pipelined)
            pl.BlockSpec((H, D), lambda i: (0, 0)),        # W1 (resident)
            pl.BlockSpec((H, 1), lambda i: (0, 0)),        # b1 (resident)
            pl.BlockSpec((O, H), lambda i: (0, 0)),        # W2 (resident)
            pl.BlockSpec((O, 1), lambda i: (0, 0)),        # b2 (resident)
        ],
        out_specs=pl.BlockSpec((O, tile_b), lambda i: (0, i)),   # lane-dense
        compiler_params=pltpu.CompilerParams(
            dimension_semantics=("parallel",),   # batch tiles are independent
            vmem_limit_bytes=vmem_limit,
        ),
        cost_estimate=cost,
    )(x_in, w1_m, b1_c, w2_m, b2_c)

    return out_t[:, :B].T        # (B, O); O is tiny, so this is cheap plumbing


if __name__ == "__main__":
    # Shapes consistent with the module: batch=8, input_dim=32, hidden_dim=32,
    # output_dim=1 (plus a larger batch to exercise the tiled/pipelined path).
    B, D, H, O = 8, 32, 32, 1
    key = jax.random.PRNGKey(0)
    kx, kw1, kb1, kw2, kb2, kx2 = jax.random.split(key, 6)

    x = jax.random.normal(kx, (B, D), dtype=jnp.float32)

    # PyTorch-style uniform init bounds (synthetic values).
    bound1 = 1.0 / (D ** 0.5)
    bound2 = 1.0 / (H ** 0.5)
    w1 = jax.random.uniform(kw1, (H, D), jnp.float32, -bound1, bound1)
    b1 = jax.random.uniform(kb1, (H,), jnp.float32, -bound1, bound1)
    w2 = jax.random.uniform(kw2, (O, H), jnp.float32, -bound2, bound2)
    b2 = jax.random.uniform(kb2, (O,), jnp.float32, -bound2, bound2)

    def ref_f32(xx):
        h = jnp.maximum(xx @ w1.T + b1, 0.0)
        return h @ w2.T + b2

    def ref_q(xx):
        # Mirrors the kernel's bf16 operand quantization (x, W1, h, W2) with
        # f32 accumulation, so remaining differences are accumulation order only.
        xq = xx.astype(jnp.bfloat16).astype(jnp.float32)
        w1q = w1.astype(jnp.bfloat16).astype(jnp.float32)
        w2q = w2.astype(jnp.bfloat16).astype(jnp.float32)
        h = jnp.maximum(xq @ w1q.T + b1, 0.0)
        h = h.astype(jnp.bfloat16).astype(jnp.float32)
        return h @ w2q.T + b2

    # 1) Small batch forced through the Pallas kernel (single 256-lane padded tile).
    out = jax.block_until_ready(mlp_forward(x, w1, b1, w2, b2, min_pallas_batch=0))
    assert out.shape == (B, O)
    assert jnp.allclose(out, ref_q(x), atol=2e-2, rtol=2e-2), "mismatch (pallas, small batch)"

    # 2) Small batch through the XLA escape hatch (exact f32 path).
    out_xla = jax.block_until_ready(mlp_forward(x, w1, b1, w2, b2))
    assert out_xla.shape == (B, O)
    assert jnp.allclose(out_xla, ref_f32(x), atol=1e-5, rtol=1e-5), "mismatch (xla fallback)"

    # 3) Larger batch: multi-step grid (>=2 tiles, lane-dense 4096-wide output blocks).
    B2 = 8192
    x2 = jax.random.normal(kx2, (B2, D), dtype=jnp.float32)
    out2 = jax.block_until_ready(mlp_forward(x2, w1, b1, w2, b2))
    assert out2.shape == (B2, O)
    assert jnp.allclose(out2, ref_q(x2), atol=2e-2, rtol=2e-2), "mismatch (pallas, tiled batch)"

    print("KERNEL_OK")
</pallas_src>

<mosaic_0001>
module attributes {stable_mosaic.version = 11 : i64} {
  func.func @kernel(%arg0: i32, %arg1: memref<256x32xf32, #tpu.memory_space<vmem>>, %arg2: memref<32x32xbf16, #tpu.memory_space<vmem>>, %arg3: memref<32x1xf32, #tpu.memory_space<vmem>>, %arg4: memref<1x32xbf16, #tpu.memory_space<vmem>>, %arg5: memref<1x1xf32, #tpu.memory_space<vmem>>, %arg6: memref<1x256xf32, #tpu.memory_space<vmem>>) attributes {dimension_semantics = [#tpu.dimension_semantics<parallel>], iteration_bounds = array<i64: 1>, scalar_prefetch = 0 : i64, scratch_operands = 0 : i64, tpu.core_type = #tpu.core_type<tc>, window_params = [{transform_indices = @transform_0, window_bounds = array<i64: 256, 32>}, {pipeline_mode = #tpu.pipeline_mode<synchronous>, transform_indices = @transform_1, window_bounds = array<i64: 32, 32>}, {pipeline_mode = #tpu.pipeline_mode<synchronous>, transform_indices = @transform_2, window_bounds = array<i64: 32, 1>}, {pipeline_mode = #tpu.pipeline_mode<synchronous>, transform_indices = @transform_3, window_bounds = array<i64: 1, 32>}, {pipeline_mode = #tpu.pipeline_mode<synchronous>, transform_indices = @transform_4, window_bounds = array<i64: 1, 1>}, {transform_indices = @transform_5, window_bounds = array<i64: 1, 256>}]} {
    %c0 = arith.constant 0 : index
    %c0_0 = arith.constant 0 : index
    %0 = vector.load %arg1[%c0, %c0_0] : memref<256x32xf32, #tpu.memory_space<vmem>>, vector<256x32xf32>
    %1 = arith.truncf %0 : vector<256x32xf32> to vector<256x32xbf16>
    %c0_1 = arith.constant 0 : index
    %c0_2 = arith.constant 0 : index
    %2 = vector.load %arg2[%c0_1, %c0_2] : memref<32x32xbf16, #tpu.memory_space<vmem>>, vector<32x32xbf16>
    %cst = arith.constant dense<0.000000e+00> : vector<32x256xf32>
    %3 = tpu.matmul %2, %1, %cst {dimension_numbers = #tpu.dot_dimension_numbers<[1], [1], [0], [0], [0, 0, 1, 0], [], []>} : vector<32x32xbf16>, vector<256x32xbf16>, vector<32x256xf32> -> vector<32x256xf32>
    %c0_3 = arith.constant 0 : index
    %c0_4 = arith.constant 0 : index
    %4 = vector.load %arg3[%c0_3, %c0_4] : memref<32x1xf32, #tpu.memory_space<vmem>>, vector<32x1xf32>
    %5 = vector.broadcast %4 : vector<32x1xf32> to vector<32x256xf32>
    %6 = arith.addf %3, %5 : vector<32x256xf32>
    %cst_5 = arith.constant 0.000000e+00 : f32
    %7 = vector.broadcast %cst_5 : f32 to vector<32x256xf32>
    %8 = arith.maximumf %6, %7 : vector<32x256xf32>
    %c0_6 = arith.constant 0 : index
    %c0_7 = arith.constant 0 : index
    %9 = vector.load %arg4[%c0_6, %c0_7] : memref<1x32xbf16, #tpu.memory_space<vmem>>, vector<1x32xbf16>
    %10 = arith.truncf %8 : vector<32x256xf32> to vector<32x256xbf16>
    %cst_8 = arith.constant dense<0.000000e+00> : vector<1x256xf32>
    %11 = tpu.matmul %9, %10, %cst_8 {dimension_numbers = #tpu.dot_dimension_numbers<[1], [0], [0], [1], [0, 0, 1, 1], [], []>} : vector<1x32xbf16>, vector<32x256xbf16>, vector<1x256xf32> -> vector<1x256xf32>
    %c0_9 = arith.constant 0 : index
    %c0_10 = arith.constant 0 : index
    %12 = vector.load %arg5[%c0_9, %c0_10] : memref<1x1xf32, #tpu.memory_space<vmem>>, vector<1x1xf32>
    %13 = vector.broadcast %12 : vector<1x1xf32> to vector<1x256xf32>
    %14 = arith.addf %11, %13 : vector<1x256xf32>
    %c0_11 = arith.constant 0 : index
    %c0_12 = arith.constant 0 : index
    %15 = vector.load %arg6[%c0_11, %c0_12] : memref<1x256xf32, #tpu.memory_space<vmem>>, vector<1x256xf32>
    tpu.vector_store %arg6[%c0_11, %c0_12], %14 {strides = array<i32>} : memref<1x256xf32, #tpu.memory_space<vmem>>, vector<1x256xf32>,
    return
  }
  func.func @transform_0(%arg0: i32) -> (i32, i32) {
    %c0_i32 = arith.constant 0 : i32
    %c0_i32_0 = arith.constant 0 : i32
    return %arg0, %c0_i32 : i32, i32
  }
  func.func @transform_1(%arg0: i32) -> (i32, i32) {
    %c0_i32 = arith.constant 0 : i32
    %c0_i32_0 = arith.constant 0 : i32
    %c0_i32_1 = arith.constant 0 : i32
    return %c0_i32, %c0_i32_0 : i32, i32
  }
  func.func @transform_2(%arg0: i32) -> (i32, i32) {
    %c0_i32 = arith.constant 0 : i32
    %c0_i32_0 = arith.constant 0 : i32
    %c0_i32_1 = arith.constant 0 : i32
    return %c0_i32, %c0_i32_0 : i32, i32
  }
  func.func @transform_3(%arg0: i32) -> (i32, i32) {
    %c0_i32 = arith.constant 0 : i32
    %c0_i32_0 = arith.constant 0 : i32
    %c0_i32_1 = arith.constant 0 : i32
    return %c0_i32, %c0_i32_0 : i32, i32
  }
  func.func @transform_4(%arg0: i32) -> (i32, i32) {
    %c0_i32 = arith.constant 0 : i32
    %c0_i32_0 = arith.constant 0 : i32
    %c0_i32_1 = arith.constant 0 : i32
    return %c0_i32, %c0_i32_0 : i32, i32
  }
  func.func @transform_5(%arg0: i32) -> (i32, i32) {
    %c0_i32 = arith.constant 0 : i32
    %c0_i32_0 = arith.constant 0 : i32
    return %c0_i32, %arg0 : i32, i32
  }
}

</mosaic_0001>

<bundles_post_ra>
// kernel: tpu_custom_call.1
= control target key start
LH: loop header
LB: loop body
LE: loop exit
PB: predicated region body
PF: predicated region fallthrough
CT: control target
= control target key end

     0   :  { %s576_s0 = inlined_call_operand.vmem [shape: f32[256,32], index: 0, kind: input, shape index: {}]   ;;  %s577_s1 = inlined_call_operand.vmem [shape: bf16[32,32], index: 1, kind: input, shape index: {}]   ;;  %s578_s2 = inlined_call_operand.vmem [shape: f32[32,1], index: 2, kind: input, shape index: {}]   ;;  %s579_s3 = inlined_call_operand.vmem [shape: bf16[1,32], index: 3, kind: input, shape index: {}]   ;;  %s580_s4 = inlined_call_operand.<no memory space> [shape: f32[1,1], index: 4, kind: input, shape index: {}]   ;;  %s581_s5 = inlined_call_operand.hbm [shape: f32[1,256], index: 5, kind: output, shape index: {}]  }
   0x1   :  { %v10_v0 = vstv %s580_s4 }
   0x2   :  { %11 = vst [vmem:[#allocation2] sm:$0x1] %v10_v0 }
   0x3   :  { %v40_v1 = vld [vmem:[%s576_s0 + $0x80] sm:$0xff]  ;;  %v41_v2 = vld [vmem:[%s576_s0 + $0x88] sm:$0xff]  ;;  %vm110_vm0 = vcmask 261120   ;;  %v42_v6 = vld [vmem:[%s576_s0 + $0x90] sm:$0xff]  ;;  %v386_v8 = vmov 0  }
   0x4   :  { %v24_v3 = vld [vmem:[%s576_s0] sm:$0xff]  ;;  %v64_v4 = vpack.c.bf16 %v41_v2, %v40_v1  ;;  %v25_v5 = vld [vmem:[%s576_s0 + $0x8] sm:$0xff]  ;;  %v43_v7 = vld [vmem:[%s576_s0 + $0x98] sm:$0xff]  ;;  %358 = vset.pattern.permute.xlu0 %v386_v8  ;;  %359 = vset.pattern.permute.xlu1 %v386_v8 }
   0x5   :  { %v56_v9 = vpack.c.bf16 %v25_v5, %v24_v3  ;;  %v65_v10 = vpack.c.bf16 %v43_v7, %v42_v6  ;;  %276 = vmatprep.mubr.bf16.mxu1 %v386_v8  ;;  %v26_v11 = vld [vmem:[%s576_s0 + $0x10] sm:$0xff]  ;;  %v27_v12 = vld [vmem:[%s576_s0 + $0x18] sm:$0xff]  ;;  %v44_v15 = vld [vmem:[%s576_s0 + $0xa0] sm:$0xff] }
   0x6   :  { %347 = vmatprep.subr.msk.bf16.mxu0 %vm110_vm0, %v64_v4  ;;  %v57_v14 = vpack.c.bf16 %v27_v12, %v26_v11  ;;  %v45_v16 = vld [vmem:[%s576_s0 + $0xa8] sm:$0xff]  ;;  %v28_v19 = vld [vmem:[%s576_s0 + $0x20] sm:$0xff]  ;;  %v78_v23 = vld [vmem:[%s578_s2 + $0x10] sm:$0xff] }
   0x7   :  { %v118_v13 = vsel %vm110_vm0, %v56_v9, 0  ;;  %v66_v18 = vpack.c.bf16 %v45_v16, %v44_v15  ;;  %v29_v20 = vld [vmem:[%s576_s0 + $0x28] sm:$0xff]  ;;  %v465_v21 = vld [vmem:[%s577_s1] sm:$0xff]  }
   0x8   :  { %328 = vmatpush3.bf16.xpose.msra.mxu0 %v118_v13  ;;  %v121_v17 = vsel %vm110_vm0, %v57_v14, 0  ;;  %v76_v22 = vld [vmem:[%s578_s2] sm:$0xff]  ;;  %343 = vmatprep.mubr.msk.bf16.mxu0 %vm110_vm0, %v465_v21  ;;  %v58_v24 = vpack.c.bf16 %v29_v20, %v28_v19 }
   0x9   :  { %348 = vmatprep.subr.msk.bf16.mxu0 %vm110_vm0, %v65_v10  ;;  %82 = vperm.xlu0 %358, %v76_v22  }
  0x10   :  { %330 = vmatpush3.bf16.xpose.msra.mxu0 %v121_v17 }
  0x11   :  { %349 = vmatprep.subr.msk.bf16.mxu0 %vm110_vm0, %v66_v18 }
  0x12   :  { %12 = vsyncpa [#allocation4], 0  ;;  %v46_v25 = vld [vmem:[%s576_s0 + $0xb0] sm:$0xff]  ;;  %v47_v26 = vld [vmem:[%s576_s0 + $0xb8] sm:$0xff]  ;;  %92 = vperm.xlu1 %359, %v78_v23   ;;  %v124_v29 = vsel %vm110_vm0, %v58_v24, 0  ;;  %s388_s16 = smov [#allocation3]  }
  0x13   :  { %v77_v27 = vld [vmem:[%s578_s2 + $0x8] sm:$0xff]  ;;  %v79_v28 = vld [vmem:[%s578_s2 + $0x18] sm:$0xff]  ;;  %v67_v30 = vpack.c.bf16 %v47_v26, %v46_v25  ;;  %v30_v31 = vld [vmem:[%s576_s0 + $0x30] sm:$0xff] }
  0x14   :  { %87 = vperm.xlu0 %358, %v77_v27   ;;  %v31_v32 = vld [vmem:[%s576_s0 + $0x38] sm:$0xff]  ;;  %v231_v33 = vld [vmem:[#allocation2] sm:$0x1]  ;;  %v49_v36 = vld [vmem:[%s576_s0 + $0xc8] sm:$0xff] }
  0x15   :  { %v59_v34 = vpack.c.bf16 %v31_v32, %v30_v31  ;;  %v48_v35 = vld [vmem:[%s576_s0 + $0xc0] sm:$0xff]  ;;  %v33_v40 = vld [vmem:[%s576_s0 + $0x48] sm:$0xff]  ;;  %v50_v42 = vld [vmem:[%s576_s0 + $0xd0] sm:$0xff] }
  0x16   :  { %97 = vperm.xlu1 %359, %v79_v28   ;;  %v68_v38 = vpack.c.bf16 %v49_v36, %v48_v35  ;;  %v32_v39 = vld [vmem:[%s576_s0 + $0x40] sm:$0xff]  ;;  %v51_v43 = vld [vmem:[%s576_s0 + $0xd8] sm:$0xff]  ;;  %v34_v46 = vld [vmem:[%s576_s0 + $0x50] sm:$0xff]  ;;  %v387_v36 = vmov 1966171168  }
  0x17   :  { %v127_v37 = vsel %vm110_vm0, %v59_v34, 0  ;;  %v60_v41 = vpack.c.bf16 %v33_v40, %v32_v39  ;;  %v69_v45 = vpack.c.bf16 %v51_v43, %v50_v42  ;;  %v35_v47 = vld [vmem:[%s576_s0 + $0x58] sm:$0xff]  ;;  %v52_v49 = vld [vmem:[%s576_s0 + $0xe0] sm:$0xff]  ;;  %v53_v50 = vld [vmem:[%s576_s0 + $0xe8] sm:$0xff]  ;;  %v237_v34 = vlaneseq }
  0x18   :  { %332 = vmatpush3.bf16.xpose.msra.mxu0 %v124_v29  ;;  %234 = vperm.xlu0 %358, %v231_v33   ;;  %v61_v48 = vpack.c.bf16 %v35_v47, %v34_v46  ;;  %v70_v52 = vpack.c.bf16 %v53_v50, %v52_v49  ;;  %v36_v53 = vld [vmem:[%s576_s0 + $0x60] sm:$0xff]  ;;  %v37_v54 = vld [vmem:[%s576_s0 + $0x68] sm:$0xff]  ;;  %v54_v56 = vld [vmem:[%s576_s0 + $0xf0] sm:$0xff] }
  0x19   :  { %350 = vmatprep.subr.msk.bf16.mxu0 %vm110_vm0, %v67_v30  ;;  %v130_v44 = vsel %vm110_vm0, %v60_v41, 0  ;;  %v62_v55 = vpack.c.bf16 %v37_v54, %v36_v53  ;;  %v55_v57 = vld [vmem:[%s576_s0 + $0xf8] sm:$0xff]  ;;  %v38_v60 = vld [vmem:[%s576_s0 + $0x70] sm:$0xff]  ;;  %v361_v0 = vld [vmem:[%s577_s1 + $0x8] sm:$0xff]   ;;  %v238_v35 = vshrl.u32 %v237_v34, 7  ;;  %vm305_vm1 = vcmp.lt.s32.totalorder %v237_v34, 256 }
  0x1a   :  { %v133_v51 = vsel %vm110_vm0, %v61_v48, 0  ;;  %v71_v59 = vpack.c.bf16 %v55_v57, %v54_v56  ;;  %v39_v61 = vld [vmem:[%s576_s0 + $0x78] sm:$0xff]  ;;  %v226_v33 = vld [vmem:[%s579_s3] sm:$0x1]  ;;  %s314_s3 = sshll.u32 %s388_s16, 4  ;;  %s315_s3 = int_to_ptr.vmem [resolvable:$true] %s314_s3 }
  0x1b   :  { %v136_v58 = vsel %vm110_vm0, %v62_v55, 0  ;;  %v63_v62 = vpack.c.bf16 %v39_v61, %v38_v60  ;;  %s362_s17 = scalar_lea.vmem %s315_s3, 32  ;;  %p367_p1 = scmp.lt.s32.totalorder %s315_s3, %s315_s3 }
  0x1c   :  { %p363_p0 = scmp.ne.s32.totalorder %s315_s3, %s362_s17  ;;  %p368_p2 = scmp.lt.s32.totalorder %s362_s17, %s362_s17 }
  0x1d   :  { %v139_v63 = vsel %vm110_vm0, %v63_v62, 0 }
  0x1e   :  { %p369_p3 = por %p368_p2, %p367_p1 }
  0x20   :  { %334 = vmatpush3.bf16.xpose.msra.mxu0 %v127_v37  ;;  %v289_v37 = vunpack.c.l.s4 %v387_v36  ;;  %p370_p4 = pnand %p369_p3, %p363_p0 }
  0x21   :  { %351 = vmatprep.subr.msk.bf16.mxu0 %vm110_vm0, %v68_v38  ;;  %v239_v38 = vsub.s32 0, %v238_v35 }
  0x22   :  { %v290_v40 = vunpack.c.0.s8 %v289_v37 }
  0x24   :  { %v293_v46 = vsub.s32 %v290_v40, %v238_v35 }
  0x28   :  { %336 = vmatpush3.bf16.xpose.msra.mxu0 %v130_v44 }
  0x29   :  { %352 = vmatprep.subr.msk.bf16.mxu0 %vm110_vm0, %v69_v45 }
  0x30   :  { %338 = vmatpush3.bf16.xpose.msra.mxu0 %v133_v51 }
  0x31   :  { %353 = vmatprep.subr.msk.bf16.mxu0 %vm110_vm0, %v70_v52 }
  0x38   :  { %340 = vmatpush3.bf16.xpose.msra.mxu0 %v136_v58 }
  0x39   :  { %354 = vmatprep.subr.msk.bf16.mxu0 %vm110_vm0, %v71_v59 }
  0x40   :  { %342 = vmatpush3.bf16.xpose.msra.mxu0 %v139_v63 }
  0x47   :  { %344 = vmatmul.mubr.msk.bf16.vlgmr.msra.gmra.mrb[0].mxu0 %vm110_vm0, %v465_v21 }
  0x48   :  { %345 = vmatprep.mubr.msk.bf16.mxu0 %vm110_vm0, %v361_v0 }
  0x4f   :  { %346 = vmatmul.mubr.msk.bf16.gmra.mrb[4].mxu0 %vm110_vm0, %v361_v0 }
  0x88   :  { %v83_v1 = vpop.permute.xlu0 %82 }
  0x91   :  { %v93_v10 = vpop.permute.xlu1 %92 }
  0x93   :  { %v88_v5 = vpop.permute.xlu0 %87 }
  0x95   :  { %v98_v21 = vpop.permute.xlu1 %97 }
  0x97   :  { %v235_v39 = vpop.permute.xlu0 %234 }
  0x98   :  { %v240_v41 = vrot.slane %v235_v39, %v239_v38 }
 0x11a   :  { %v199_v2 = vpop.f32.mrb[0].mxu0 }
 0x11b   :  { %v200_v3 = vadd.f32 %v199_v2, %v83_v1  ;;  %v201_v4 = vpop.f32.mrb[1].mxu0 }
 0x11c   :  { %v202_v6 = vadd.f32 %v201_v4, %v83_v1  ;;  %v203_v7 = vpop.f32.mrb[2].mxu0 }
 0x11d   :  { %v204_v8 = vadd.f32 %v203_v7, %v88_v5  ;;  %v205_v9 = vpop.f32.mrb[3].mxu0  ;;  %v218_v12 = vmax.f32 %v200_v3, 0.0 }
 0x11e   :  { %v206_v11 = vadd.f32 %v205_v9, %v88_v5  ;;  %v219_v14 = vmax.f32 %v202_v6, 0.0 }
 0x11f   :  { %v220_v13 = vmax.f32 %v204_v8, 0.0 }
 0x120   :  { %v221_v15 = vmax.f32 %v206_v11, 0.0 }
 0x121   :  { %v227_v16 = vpack.c.bf16 %v220_v13, %v218_v12 }
 0x122   :  { %v209_v17 = vpop.f32.mrb[4].mxu0  ;;  %v228_v18 = vpack.c.bf16 %v221_v15, %v219_v14 }
 0x123   :  { %v210_v19 = vadd.f32 %v209_v17, %v93_v10  ;;  %v211_v20 = vpop.f32.mrb[5].mxu0 }
 0x124   :  { %v212_v22 = vadd.f32 %v211_v20, %v93_v10  ;;  %v213_v23 = vpop.f32.mrb[6].mxu0  ;;  %244 = vmatprep.subr.bf16.mxu1 %v228_v18 }
 0x125   :  { %v214_v24 = vadd.f32 %v213_v23, %v98_v21  ;;  %v215_v25 = vpop.f32.mrb[7].mxu0  ;;  %245 = vmatpush1.bf16.msra.mxu1 %v227_v16  ;;  %v222_v27 = vmax.f32 %v210_v19, 0.0 }
 0x126   :  { %v216_v26 = vadd.f32 %v215_v25, %v98_v21  ;;  %v223_v29 = vmax.f32 %v212_v22, 0.0 }
 0x127   :  { %v224_v28 = vmax.f32 %v214_v24, 0.0 }
 0x128   :  { %v225_v30 = vmax.f32 %v216_v26, 0.0 }
 0x129   :  { %v229_v31 = vpack.c.bf16 %v224_v28, %v222_v27 }
 0x12a   :  { %v230_v32 = vpack.c.bf16 %v225_v30, %v223_v29 }
 0x12c   :  { %246 = vmatprep.subr.bf16.mxu1 %v230_v32 }
 0x12d   :  { %247 = vmatpush1.bf16.msra.mxu1 %v229_v31 }
 0x130   :  { %326 = vmatmul.mubr.msk.bf16.vlgmr.msra.gmra.mrb[0].mxu1 %vm110_vm0, %v226_v33 }
 0x203   :  { %v278_v42 = vpop.f32.mrb[0].mxu1 }
 0x204   :  { %v279_v43 = vadd.f32 %v278_v42, %v240_v41  ;;  %v280_v44 = vpop.f32.mrb[1].mxu1 }
 0x205   :  { %v281_v45 = vadd.f32 %v280_v44, %v240_v41  ;;  %v282_v47 = vpop.f32.mrb[2].mxu1 }
 0x206   :  { %v283_v48 = vpop.f32.mrb[3].mxu1 }
 0x207   :  { %v287_v49 = vcombine.low %v279_v43, %v281_v45 }
 0x209   :  { %v294_v50 = vrot.slane %v287_v49, %v293_v46 }
 0x20b   :  { %v301_v51 = vrot.slane %v294_v50, %v293_v46 }
 0x20d   :  { %307 = vst.msk [vmem:[#allocation3] sm:$0x3] %vm305_vm1, %v301_v51 }
 0x20e   :  { %373 = shalt.err (!%p370_p4)
}
 0x20f   :  { %s374_s20 = scalar_lea.hbm %s581_s5, 32 }
 0x210   :  { %p375_p5 = scmp.ne.s32.totalorder %s581_s5, %s374_s20  ;;  %p378_p6 = scmp.lt.u32.totalorder %s374_s20, %s581_s5 }
 0x212   :  { %p380_p7 = pnand %p378_p6, %p375_p5 }
 0x214   :  { %383 = shalt.err (!%p380_p7)
}
 0x215   :  { %317 = dma.vmem_to_hbm [thread:$0]  %s315_s3, 32, %s581_s5, [#allocation4]  }
 0x216   :  { %384 = dma.done.wait [#allocation4], 32  }
 0x217   :  { %385 = vsyncadd [#allocation4], 4294967264 }
 0x218   :  { %321 = vsyncpa [#allocation4], 1 }

</bundles_post_ra>
